<compile_context>
chip_gen: v7x
topology: tpu7x:2x2x1
jax: 0.10.0
libtpu: 0.0.40
codegen_flags: <defaults>
</compile_context>

<pallas_src>
import functools

import numpy as np
import jax
import jax.numpy as jnp
from jax.experimental import pallas as pl
from jax.experimental.pallas import tpu as pltpu

EPS = 1e-12
_EPS_SQ = EPS * EPS


@functools.lru_cache(maxsize=1)
def _vmem_capacity_bytes():
    """Physical VMEM per TensorCore; conservative 64 MiB (v7x) if unknown."""
    default = 64 * 1024 * 1024
    try:
        info = pltpu.get_tpu_info()
    except Exception:
        return default
    for attr in ("vmem_capacity_bytes", "vmem_bytes", "vmem_size_bytes"):
        val = getattr(info, attr, None)
        if val:
            return int(val)
    return default


# ----------------------------- kernels --------------------------------------


def _l2norm_rows_2d_kernel(x_ref, o_ref):
    # x_ref/o_ref: (TN, D) blocks. One L2 norm per row; rsqrt goes to the EUP.
    x = x_ref[...]
    xf = x.astype(jnp.float32)
    sumsq = jnp.sum(xf * xf, axis=-1, keepdims=True)            # (TN, 1) f32
    inv = jax.lax.rsqrt(jnp.maximum(sumsq, _EPS_SQ))            # == 1/max(||x||, eps)
    o_ref[...] = (x * inv.astype(x.dtype)).astype(o_ref.dtype)  # native-dtype scale


def _l2norm_rows_3d_kernel(x_ref, o_ref):
    # Small-batch path: x_ref/o_ref are (TN, D/128, 128); one sample fills
    # whole (8,128) vregs even when the batch is tiny.
    x = x_ref[...]
    xf = x.astype(jnp.float32)
    sumsq = jnp.sum(xf * xf, axis=(1, 2), keepdims=True)        # (TN, 1, 1)
    inv = jax.lax.rsqrt(jnp.maximum(sumsq, _EPS_SQ))
    o_ref[...] = (x * inv.astype(x.dtype)).astype(o_ref.dtype)


def _sumsq_rows_kernel(x_ref, ss_ref, *, d_total, td, mask_tail):
    # Pass 1 of the large-D path. Grid = (row tiles, D tiles); the (TN, 1)
    # output block is resident across the "arbitrary" D axis and accumulates.
    j = pl.program_id(1)

    @pl.when(j == 0)
    def _():
        ss_ref[...] = jnp.zeros_like(ss_ref)

    xf = x_ref[...].astype(jnp.float32)
    if mask_tail:
        # Last D tile may be padded with garbage; zero it before reducing.
        col = j * td + jax.lax.broadcasted_iota(jnp.int32, xf.shape, 1)
        xf = jnp.where(col < d_total, xf, 0.0)
    ss_ref[...] += jnp.sum(xf * xf, axis=-1, keepdims=True)


def _scale_rows_kernel(x_ref, ss_ref, o_ref):
    # Pass 2 of the large-D path: scale each (TN, TD) tile by the row rsqrt.
    x = x_ref[...]
    inv = jax.lax.rsqrt(jnp.maximum(ss_ref[...], _EPS_SQ))      # (TN, 1) f32
    o_ref[...] = (x * inv.astype(x.dtype)).astype(o_ref.dtype)


# ----------------------------- wrapper ---------------------------------------


def _pattern_norm_jax(x2d):
    """Fused XLA fallback (narrow rows / tiny problems)."""
    xf = x2d.astype(jnp.float32)
    norm = jnp.sqrt(jnp.sum(xf * xf, axis=1, keepdims=True))
    inv = 1.0 / jnp.maximum(norm, EPS)
    return (xf * inv).astype(x2d.dtype)


def pattern_norm(x, scale=1.0, *, block_budget_bytes=None,
                 min_pallas_bytes=256 * 1024):
    """JAX/Pallas equivalent of the PyTorch pattern_norm.forward()."""
    del scale  # stored by the PyTorch module but unused by forward()
    sizes = x.shape
    if len(sizes) <= 2:
        # PyTorch module returns the input unchanged in this case.
        return x

    n = int(sizes[0])
    d = int(np.prod(sizes[1:]))
    itemsize = int(np.dtype(x.dtype).itemsize)
    total_bytes = n * d * itemsize
    row_bytes = d * itemsize

    # Narrow rows (D < 128 -> masked vst partial stores) or tiny problems:
    # kernel-launch + pipeline overhead dominates, XLA fuses this fine.
    if d < 128 or total_bytes < min_pallas_bytes:
        return _pattern_norm_jax(x.reshape(n, d)).reshape(sizes)

    # Generation-aware budgets: keep in+out double buffers (~4 blocks) plus f32
    # temporaries inside scoped VMEM on every generation
    # (v5e/v6e: 128 MiB physical -> 64 MiB limit, v7x: 64 MiB -> 48 MiB limit).
    vmem_limit = int(min(_vmem_capacity_bytes() * 3 // 4, 64 * 1024 * 1024))
    if block_budget_bytes is None:
        block_budget_bytes = min(4 * 1024 * 1024, vmem_limit // 8)
    block_budget_bytes = int(max(block_budget_bytes, 8 * 128 * itemsize))

    sublane = max(8, 32 // itemsize)          # 8 f32 / 16 bf16 / 32 int8
    min_rows = n if n < sublane else sublane  # smallest legal 2D row tile

    cost = pl.CostEstimate(flops=3 * n * d, transcendentals=n,
                           bytes_accessed=2 * total_bytes)
    d1 = d // 128

    # ---- small-batch 3D fast path -------------------------------------------
    if (d % 128 == 0 and n < 8 and d1 >= 8
            and row_bytes <= block_budget_bytes):
        tn = max(1, block_budget_bytes // row_bytes)
        if n > 1:
            tn = min(tn, pl.cdiv(n, 2))      # >=2 grid steps -> both TCs busy
        tn = min(tn, n)
        grid = (pl.cdiv(n, tn),)
        out = pl.pallas_call(
            _l2norm_rows_3d_kernel,
            out_shape=jax.ShapeDtypeStruct((n, d1, 128), x.dtype),
            grid_spec=pltpu.PrefetchScalarGridSpec(
                num_scalar_prefetch=0, grid=grid,
                in_specs=[pl.BlockSpec((tn, d1, 128), lambda i: (i, 0, 0))],
                out_specs=pl.BlockSpec((tn, d1, 128), lambda i: (i, 0, 0))),
            compiler_params=pltpu.CompilerParams(
                dimension_semantics=("parallel",),
                vmem_limit_bytes=vmem_limit),
            cost_estimate=cost,
        )(x.reshape(n, d1, 128))
        return out.reshape(sizes)

    # ---- main path: stream (TN, D) row blocks -------------------------------
    if min_rows * row_bytes <= block_budget_bytes:
        tn = max(min_rows, block_budget_bytes // row_bytes)
        if n > 1:
            tn = min(tn, pl.cdiv(n, 2))      # guarantee >=2 steps when possible
        tn = min(tn, n)
        if tn < n:
            tn = max(sublane, (tn // sublane) * sublane)
            if tn >= n:
                tn = n
        grid = (pl.cdiv(n, tn),)
        out = pl.pallas_call(
            _l2norm_rows_2d_kernel,
            out_shape=jax.ShapeDtypeStruct((n, d), x.dtype),
            grid_spec=pltpu.PrefetchScalarGridSpec(
                num_scalar_prefetch=0, grid=grid,
                in_specs=[pl.BlockSpec((tn, d), lambda i: (i, 0))],
                out_specs=pl.BlockSpec((tn, d), lambda i: (i, 0))),
            compiler_params=pltpu.CompilerParams(
                dimension_semantics=("parallel",),
                vmem_limit_bytes=vmem_limit),
            cost_estimate=cost,
        )(x.reshape(n, d))
        return out.reshape(sizes)

    # ---- very large D: two passes over D ------------------------------------
    # Pass 1 reduces sum-of-squares per row into a resident (TN, 1) block;
    # pass 2 rescales each (TN, TD) tile. Both streams stay within the budget.
    tn = min_rows
    td = max(128, (block_budget_bytes // (tn * itemsize)) // 128 * 128)
    td = min(td, d)
    grid = (pl.cdiv(n, tn), pl.cdiv(d, td))
    x2d = x.reshape(n, d)

    sumsq = pl.pallas_call(
        functools.partial(_sumsq_rows_kernel, d_total=d, td=td,
                          mask_tail=(d % td != 0)),
        out_shape=jax.ShapeDtypeStruct((n, 1), jnp.float32),
        grid_spec=pltpu.PrefetchScalarGridSpec(
            num_scalar_prefetch=0, grid=grid,
            in_specs=[pl.BlockSpec((tn, td), lambda i, j: (i, j))],
            out_specs=pl.BlockSpec((tn, 1), lambda i, j: (i, 0))),
        compiler_params=pltpu.CompilerParams(
            dimension_semantics=("parallel", "arbitrary"),
            vmem_limit_bytes=vmem_limit),
        cost_estimate=pl.CostEstimate(flops=2 * n * d, transcendentals=0,
                                      bytes_accessed=total_bytes),
    )(x2d)

    out = pl.pallas_call(
        _scale_rows_kernel,
        out_shape=jax.ShapeDtypeStruct((n, d), x.dtype),
        grid_spec=pltpu.PrefetchScalarGridSpec(
            num_scalar_prefetch=0, grid=grid,
            in_specs=[pl.BlockSpec((tn, td), lambda i, j: (i, j)),
                      pl.BlockSpec((tn, 1), lambda i, j: (i, 0))],
            out_specs=pl.BlockSpec((tn, td), lambda i, j: (i, j))),
        compiler_params=pltpu.CompilerParams(
            dimension_semantics=("parallel", "parallel"),
            vmem_limit_bytes=vmem_limit),
        cost_estimate=pl.CostEstimate(flops=n * d, transcendentals=n,
                                      bytes_accessed=2 * total_bytes),
    )(x2d, sumsq)
    return out.reshape(sizes)


# ----------------------------- self-test --------------------------------------


def pattern_norm_ref(x):
    """Pure-JAX reference mirroring torch.nn.functional.normalize(p=2, dim=1)."""
    sizes = x.shape
    if len(sizes) <= 2:
        return x
    n = sizes[0]
    x2d = x.reshape(n, -1).astype(jnp.float32)
    norm = jnp.sqrt(jnp.sum(x2d * x2d, axis=1, keepdims=True))
    out = x2d / jnp.maximum(norm, EPS)
    return out.reshape(sizes).astype(x.dtype)


if __name__ == "__main__":
    # 1) Canonical small NCHW input (batch=2, C=4, 16x16). Forcing the Pallas
    #    path (min_pallas_bytes=0) exercises the small-batch 3D kernel.
    x = jax.random.normal(jax.random.PRNGKey(0), (2, 4, 16, 16),
                          dtype=jnp.float32)
    out = jax.block_until_ready(pattern_norm(x, min_pallas_bytes=0))
    np.testing.assert_allclose(np.asarray(out), np.asarray(pattern_norm_ref(x)),
                               rtol=1e-5, atol=1e-5)
    norms = jnp.linalg.norm(out.reshape(out.shape[0], -1), axis=1)
    np.testing.assert_allclose(np.asarray(norms), np.ones(out.shape[0]),
                               rtol=1e-5, atol=1e-5)
    # Default dispatch (tiny input -> fused XLA fallback) must agree too.
    np.testing.assert_allclose(np.asarray(pattern_norm(x)),
                               np.asarray(pattern_norm_ref(x)),
                               rtol=1e-5, atol=1e-5)

    # 2) Larger batch -> main (TN, D) row-streaming kernel.
    x2 = jax.random.normal(jax.random.PRNGKey(1), (128, 4, 16, 16),
                           dtype=jnp.float32)
    out2 = jax.block_until_ready(pattern_norm(x2))
    np.testing.assert_allclose(np.asarray(out2), np.asarray(pattern_norm_ref(x2)),
                               rtol=1e-5, atol=1e-5)

    # 3) Non-128-aligned D (>= 128) on the 2D kernel (full-D last dim block).
    x3 = jax.random.normal(jax.random.PRNGKey(2), (16, 3, 8, 9),
                           dtype=jnp.float32)
    out3 = jax.block_until_ready(pattern_norm(x3, min_pallas_bytes=0))
    np.testing.assert_allclose(np.asarray(out3), np.asarray(pattern_norm_ref(x3)),
                               rtol=1e-5, atol=1e-5)

    # 4) Very-large-D two-pass path, exercised at small scale by shrinking the
    #    per-block byte budget (same code path as rows that overflow VMEM).
    x4 = jax.random.normal(jax.random.PRNGKey(3), (16, 5, 9, 40),
                           dtype=jnp.float32)
    out4 = jax.block_until_ready(
        pattern_norm(x4, min_pallas_bytes=0, block_budget_bytes=32 * 1024))
    np.testing.assert_allclose(np.asarray(out4), np.asarray(pattern_norm_ref(x4)),
                               rtol=1e-5, atol=1e-5)

    # 5) D < 128 (masked-lane case) falls back to fused XLA; ndim <= 2 passthrough.
    x5 = jax.random.normal(jax.random.PRNGKey(4), (16, 3, 5, 7),
                           dtype=jnp.float32)
    np.testing.assert_allclose(np.asarray(pattern_norm(x5)),
                               np.asarray(pattern_norm_ref(x5)),
                               rtol=1e-5, atol=1e-5)
    x6 = jax.random.normal(jax.random.PRNGKey(5), (4, 32), dtype=jnp.float32)
    np.testing.assert_array_equal(np.asarray(pattern_norm(x6)), np.asarray(x6))

    # 6) bf16 input: f32 sumsq accumulation, native-dtype scaling.
    x7 = jax.random.normal(jax.random.PRNGKey(6), (128, 4, 16, 16),
                           dtype=jnp.bfloat16)
    out7 = jax.block_until_ready(pattern_norm(x7))
    np.testing.assert_allclose(np.asarray(out7.astype(jnp.float32)),
                               np.asarray(pattern_norm_ref(x7).astype(jnp.float32)),
                               rtol=5e-2, atol=2e-2)

    print("KERNEL_OK")
</pallas_src>

<mosaic_0001>
module attributes {stable_mosaic.version = 11 : i64} {
  func.func @_l2norm_rows_3d_kernel(%arg0: i32, %arg1: memref<1x8x128xf32, #tpu.memory_space<vmem>>, %arg2: memref<1x8x128xf32, #tpu.memory_space<vmem>>) attributes {dimension_semantics = [#tpu.dimension_semantics<parallel>], iteration_bounds = array<i64: 2>, scalar_prefetch = 0 : i64, scratch_operands = 0 : i64, tpu.core_type = #tpu.core_type<tc>, window_params = [{transform_indices = @transform_0, window_bounds = array<i64: 1, 8, 128>}, {transform_indices = @transform_1, window_bounds = array<i64: 1, 8, 128>}]} {
    %c0 = arith.constant 0 : index
    %c0_0 = arith.constant 0 : index
    %c0_1 = arith.constant 0 : index
    %0 = vector.load %arg1[%c0, %c0_0, %c0_1] : memref<1x8x128xf32, #tpu.memory_space<vmem>>, vector<1x8x128xf32>
    %1 = arith.mulf %0, %0 : vector<1x8x128xf32>
    %cst = arith.constant dense<0.000000e+00> : vector<1xf32>
    %2 = vector.multi_reduction <add>, %1, %cst [1, 2] : vector<1x8x128xf32> to vector<1xf32>
    %3 = vector.shape_cast %2 : vector<1xf32> to vector<1x1x1xf32>
    %cst_2 = arith.constant 1.000000e-24 : f32
    %4 = vector.broadcast %cst_2 : f32 to vector<1x1x1xf32>
    %5 = arith.maximumf %3, %4 : vector<1x1x1xf32>
    %6 = math.rsqrt %5 : vector<1x1x1xf32>
    %7 = vector.broadcast %6 : vector<1x1x1xf32> to vector<1x8x128xf32>
    %8 = arith.mulf %0, %7 : vector<1x8x128xf32>
    %c0_3 = arith.constant 0 : index
    %c0_4 = arith.constant 0 : index
    %c0_5 = arith.constant 0 : index
    %9 = vector.load %arg2[%c0_3, %c0_4, %c0_5] : memref<1x8x128xf32, #tpu.memory_space<vmem>>, vector<1x8x128xf32>
    tpu.vector_store %arg2[%c0_3, %c0_4, %c0_5], %8 {strides = array<i32>} : memref<1x8x128xf32, #tpu.memory_space<vmem>>, vector<1x8x128xf32>,
    return
  }
  func.func @transform_0(%arg0: i32) -> (i32, i32, i32) {
    %c0_i32 = arith.constant 0 : i32
    %c0_i32_0 = arith.constant 0 : i32
    %c0_i32_1 = arith.constant 0 : i32
    return %arg0, %c0_i32, %c0_i32_0 : i32, i32, i32
  }
  func.func @transform_1(%arg0: i32) -> (i32, i32, i32) {
    %c0_i32 = arith.constant 0 : i32
    %c0_i32_0 = arith.constant 0 : i32
    %c0_i32_1 = arith.constant 0 : i32
    return %arg0, %c0_i32, %c0_i32_0 : i32, i32, i32
  }
}

</mosaic_0001>

<bundles_post_ra>
// kernel: tpu_custom_call.1
= control target key start
LH: loop header
LB: loop body
LE: loop exit
PB: predicated region body
PF: predicated region fallthrough
CT: control target
= control target key end

     0   :  { %6 = vsyncpa [#allocation3], 0  ;;  %s561_s0 = inlined_call_operand.hbm [shape: f32[2,8,128], index: 0, kind: input, shape index: {}]   ;;  %s562_s1 = inlined_call_operand.hbm [shape: f32[2,8,128], index: 1, kind: output, shape index: {}]  }
   0x1   :  { %8 = vsyncpa [#allocation3 + $0x1], 0 }
   0x2   :  { %9 = vsyncpa [#allocation4], 0 }
   0x3   :  { %11 = vsyncpa [#allocation4 + $0x1], 0  ;;  %s400_s6 = smov 0   ;;  %s402_s7 = smov 0  }
   0x4   :  { %s404_s8 = smov 0   ;;  %s406_s9 = smov 0  }
   0x5 LB: > { %s421_s10 = sadd.s32 4294967295, %s386_s9   ;;  %s230_s11 = sadd.s32 4294967294, %s386_s9   ;;  %s386_s9 = sphi %s406_s9, %s577_s9   ;;  %s382_s8 = sphi %s404_s8, %s576_s8   ;;  %s378_s7 = sphi %s402_s7, %s575_s7   ;;  %s374_s6 = sphi %s400_s6, %s574_s6  }
   0x6   : > { %s425_s12 = sadd.s32 1, %s386_s9   ;;  %s24_s13 = sadd.s32 1, %s382_s8 }
   0x7   : > { %s21_s14 = ssub.s32 %s386_s9, %s425_s12  ;;  %p31_p0 = scmp.ne.s32.totalorder %s382_s8, %s378_s7 }
   0x8   : > { %p22_p1 = scmp.eq.s32.totalorder %s21_s14, 0  ;;  %p32_p2 = scmp.eq.s32.totalorder %s386_s9, 0 }
   0x9   : > { %p37_p3 = scmp.ne.s32.totalorder %s378_s7, %s374_s6  ;;  %p38_p4 = scmp.eq.s32.totalorder %s421_s10, 0 }
   0xa   : > { %s437_s15 = scalar_select %p22_p1, %s382_s8, %s24_s13  }
   0xb   : > { %p439_p5 = por %p32_p2, %p31_p0  ;;  %p443_p6 = por %p38_p4, %p37_p3 }
   0xc   : > { %p61_p7 = scmp.eq.s32.totalorder %s421_s10, 1  ;;  %p67_p8 = scmp.eq.s32.totalorder %s230_s11, 1 }
   0xd   : > { %p254_p10 = scmp.lt.s32.totalorder %s386_s9, 2  ;;  %s87_s20 = sand.u32 1, %s382_s8  }
   0xe   : > { %p450_p11 = por %p61_p7, %p31_p0  ;;  %p454_p12 = por %p67_p8, %p37_p3 }
   0xf   : > { %s234_s21 = sshll.u32 %s386_s9, 7  ;;  %s233_s22 = sshll.u32 %s87_s20, 3 }
  0x10   : > { %s566_s18 = scalar_select %p450_p11, 1, 0 }
  0x11   : > { %s567_s19 = scalar_select %p454_p12, 1, 0 }
  0x12   : > { %s463_s25 = scalar_lea.hbm %s561_s0, %s234_s21  ;;  %s91_s26 = scalar_lea.vmem [#allocation2], %s233_s22 }
  0x13   : > { %s98_s27 = sshll.u32 %s91_s26, 4  ;;  %p467_p13 = pnand %p254_p10, %p439_p5  ;;  %s471_s27 = int_to_ptr.vmem [resolvable:$true] %s98_s27 }
  0x14   : > { %s88_s29 = scalar_lea.sflag [#allocation3], %s87_s20  ;;  %s290_s30 = scalar_lea.hbm %s463_s25, 128 }
  0x15   : > { %p291_p2 = scmp.ne.s32.totalorder %s463_s25, %s290_s30  ;;  %p292_p3 = pneg %p467_p13 }
  0x16   : > { %s295_s4 = scalar_lea.hbm %s561_s0, 256  ;;  %p296_p5 = scmp.lt.u32.totalorder %s463_s25, %s561_s0 }
  0x17   : > { %p293_p4 = pnand %p292_p3, %p291_p2  ;;  %p297_p8 = scmp.lt.u32.totalorder %s295_s4, %s290_s30 }
  0x18   : > { %p299_p9 = scmp.lt.u32.totalorder %s290_s30, %s463_s25 }
  0x19   : > { %p294_p7 = pneg %p293_p4  ;;  %p298_p10 = por %p297_p8, %p296_p5 }
  0x1b   : > { %p300_p0 = por %p299_p9, %p298_p10 }
  0x1d   : > { %p301_p1 = pnand %p300_p0, %p294_p7 }
  0x1f   : > { %304 = shalt.err (!%p301_p1)
}
  0x20   : > { %s305_s13 = scalar_lea.vmem %s471_s27, 128  ;;  %s388_s14 = smov [#allocation2]  }
  0x21   : > { %p306_p2 = scmp.ne.s32.totalorder %s471_s27, %s305_s13  ;;  %s310_s16 = sshll.u32 %s388_s14, 4  ;;  %s311_s16 = int_to_ptr.vmem [resolvable:$false] %s310_s16 }
  0x22   : > { %s312_s20 = scalar_lea.vmem %s311_s16, 256  ;;  %p313_p11 = scmp.lt.s32.totalorder %s471_s27, %s311_s16 }
  0x23   : > { %p308_p4 = pnand %p306_p2, %p292_p3  ;;  %p314_p5 = scmp.lt.s32.totalorder %s312_s20, %s305_s13 }
  0x25   : > { %p309_p12 = pneg %p308_p4  ;;  %p315_p8 = por %p314_p5, %p313_p11 }
  0x27   : > { %p316_p9 = pnand %p315_p8, %p309_p12 }
  0x29   : > { %319 = shalt.err (!%p316_p9)
}
  0x2a   : > { %249 = dma.hbm_to_vmem [thread:$0]  (!%p467_p13), %s463_s25, 128, %s471_s27, %s88_s29  }
  0x2b   : > { %p569_p0 = scmp.lt.s32.totalorder %s386_s9, 3  ;;  %p570_p1 = scmp.ge.s32.totalorder %s386_s9, 1 }
  0x2d   : > { %p104_p3 = pnand %p570_p1, %p569_p0 }
  0x2e   : > { %s505_s21 = sand.u32 (!%p104_p3), 1, %s378_s7  }
  0x2f   : > { %107 = sbr.rel (%p104_p3) target bundleno = 241 (0xf1), region = 24  ;;  %s236_s22 = sshll.u32 (!%p104_p3), %s505_s21, 3 }
  0x30   : > { %s110_s23 = scalar_lea.sflag (!%p104_p3), [#allocation3], %s505_s21  ;;  %s113_s24 = scalar_lea.vmem (!%p104_p3), [#allocation2], %s236_s22 }
  0x36   : > { %365 = dma.done.wait (%p443_p6), %s110_s23, 128  }
  0x37   : > { %367 = vsyncadd (%p443_p6), %s110_s23, 4294967168  ;;  %v132_v0 = vld [vmem:[%s113_s24] sm:$0xff]  ;;  %s239_s25 = sshll.u32 %s421_s10, 7  ;;  %s131_s26 = scalar_lea.vmem [#allocation5], %s236_s22 }
  0x38   : > { %v133_v1 = vmul.f32 %v132_v0, %v132_v0  ;;  %s160_s27 = sshll.u32 %s131_s26, 4  ;;  %s517_s29 = scalar_lea.hbm %s562_s1, %s239_s25  ;;  %s519_s27 = int_to_ptr.vmem [resolvable:$true] %s160_s27 }
  0x39   : > { %s147_s30 = scalar_lea.sflag [#allocation4], %s505_s21  ;;  %s320_s2 = scalar_lea.vmem %s519_s27, 128 }
  0x3a   : > { %134 = vadd.xlane.f32.xlu0 %v133_v1  ;;  %p321_p6 = scmp.ne.s32.totalorder %s519_s27, %s320_s2  ;;  %p571_p11 = scmp.ne.s32.totalorder %s566_s18, 0 }
  0x3b   : > { %s389_s10 = smov [#allocation5]  }
  0x3c   : > { %p322_p12 = pnand %p321_p6, %p571_p11  ;;  %s324_s3 = sshll.u32 %s389_s10, 4  ;;  %s325_s3 = int_to_ptr.vmem [resolvable:$false] %s324_s3 }
  0x3d   : > { %s326_s4 = scalar_lea.vmem %s325_s3, 256  ;;  %p327_p7 = scmp.lt.s32.totalorder %s519_s27, %s325_s3 }
  0x3e   : > { %p323_p13 = pneg %p322_p12  ;;  %p328_p10 = scmp.lt.s32.totalorder %s326_s4, %s320_s2 }
  0x40   : > { %p329_p2 = por %p328_p10, %p327_p7 }
  0x42   : > { %p330_p4 = pnand %p329_p2, %p323_p13 }
  0xc7   : > { %v135_v2 = vpop.xlane.xlu0 %134 }
  0xc8   : > { %v136_v3 = vrot.slane %v135_v2, 4 }
  0xca   : > { %v137_v4 = vadd.f32 %v136_v3, %v135_v2 }
  0xcc   : > { %v138_v5 = vrot.slane %v137_v4, 2 }
  0xce   : > { %v139_v6 = vadd.f32 %v138_v5, %v137_v4 }
  0xd0   : > { %v140_v7 = vrot.slane %v139_v6, 1 }
  0xd2   : > { %v141_v8 = vadd.f32 %v140_v7, %v139_v6 }
  0xd4   : > { %v142_v9 = vmax.f32 %v141_v8, 1e-24 }
  0xd6   : > { %288 = vrsqrt.f32 %v142_v9 }
  0xe0   : > { %v289_v10 = vpop.eup %288 }
  0xe1   : > { %v144_v11 = vmul.f32 %v289_v10, %v132_v0 }
  0xe3   : > { %145 = vst [vmem:[%s131_s26] sm:$0xff] %v144_v11 }
  0xe4   : > { %333 = shalt.err (!%p330_p4)
}
  0xe5   : > { %s334_s5 = scalar_lea.hbm %s517_s29, 128  ;;  %s338_s14 = scalar_lea.hbm %s562_s1, 256 }
  0xe6   : > { %p335_p5 = scmp.ne.s32.totalorder %s517_s29, %s334_s5  ;;  %p339_p0 = scmp.lt.u32.totalorder %s517_s29, %s562_s1 }
  0xe7   : > { %p340_p1 = scmp.lt.u32.totalorder %s338_s14, %s334_s5  ;;  %p342_p6 = scmp.lt.u32.totalorder %s334_s5, %s517_s29 }
  0xe8   : > { %p336_p8 = pnand %p335_p5, %p571_p11 }
  0xe9   : > { %p341_p3 = por %p340_p1, %p339_p0 }
  0xea   : > { %p337_p9 = pneg %p336_p8 }
  0xeb   : > { %p343_p12 = por %p342_p6, %p341_p3 }
  0xed   : > { %p344_p13 = pnand %p343_p12, %p337_p9 }
  0xef   : > { %347 = shalt.err (!%p344_p13)
}
  0xf0   : > { %244 = dma.vmem_to_hbm [thread:$0]  (%p571_p11), %s519_s27, 128, %s517_s29, %s147_s30  }
  0xf1 PF: > { %s172_s21 = sand.u32 1, %s374_s6   ;;  %p572_p7 = scmp.ne.s32.totalorder %s567_s19, 0 }
  0xf2   : > { %p573_p10 = scmp.ge.s32.totalorder %s386_s9, 2  ;;  %s173_s22 = scalar_lea.sflag [#allocation4], %s172_s21 }
  0xf4   : > { %p251_p2 = pnand %p573_p10, %p572_p7 }
  0xf6   : > { %369 = dma.done.wait (!%p251_p2), %s173_s22, 128  }
  0xf7   : > { %371 = vsyncadd (!%p251_p2), %s173_s22, 4294967168  ;;  %p14_p4 = scmp.ge.s32.totalorder %s425_s12, 4   ;;  %s574_s6 = smov %s378_s7 }
  0xf8   : > { %s575_s7 = smov %s382_s8  ;;  %s576_s8 = smov %s437_s15 }
  0xf9   : > { %s577_s9 = smov %s425_s12  ;;  %16 = sbr.rel (!%p14_p4) target bundleno = 5 (0x5), region = 69 }
 0x100   :  { %178 = vsyncpa [#allocation3], 1 }
 0x101   :  { %180 = vsyncpa [#allocation3 + $0x1], 1 }
 0x102   :  { %181 = vsyncpa [#allocation4], 1 }
 0x103   :  { %183 = vsyncpa [#allocation4 + $0x1], 1 }

</bundles_post_ra>
